<compile_context>
chip_gen: v7x
topology: tpu7x:2x2x1
jax: 0.10.0
libtpu: 0.0.40
codegen_flags: <defaults>
</compile_context>

<pallas_src>
import jax
import jax.numpy as jnp
from jax.experimental import pallas as pl
from jax.experimental.pallas import tpu as pltpu


def _round_up(x, m):
    return ((x + m - 1) // m) * m


def adapter_kernel(x_ref, w1_ref, w2_ref, o_ref):
    # x_ref: (tile_m, Cp), w1_ref: (Cp, Hp), w2_ref: (Hp, Cp), o_ref: (tile_m, Cp)
    x = x_ref[...]
    # fc[0] Linear(C -> H) + fc[1] ReLU   (f32 accumulation on the MXU, no transpose)
    h = jnp.dot(x, w1_ref[...], preferred_element_type=jnp.float32)
    # ReLU on the f32 accumulator; cast keeps the 2nd dot on the bf16 MXU path when the
    # weights are bf16 (no-op for f32 weights).
    h = jnp.maximum(h, 0.0).astype(w2_ref.dtype)
    # fc[2] Linear(H -> C) + fc[3] ReLU
    y = jnp.dot(h, w2_ref[...], preferred_element_type=jnp.float32)
    o_ref[...] = jnp.maximum(y, 0.0).astype(o_ref.dtype)


def adapter_forward(x, w1, w2, *, tile_m=None):
    """x: (N, C), w1: (H, C), w2: (C, H)  ->  (N, C) = ReLU(ReLU(x @ W1.T) @ W2.T)."""
    N, C = x.shape
    H = w1.shape[0]
    assert w1.shape == (H, C) and w2.shape == (C, H)

    # ---- pad feature / hidden dims to lane width (exact for bias-free Linear + ReLU) ----
    Cp = _round_up(C, 128)
    Hp = _round_up(H, 128)

    # One-time transposes + padding outside the kernel (plain XLA ops, amortized).
    w1_ch = jnp.transpose(w1)                      # (C, H)
    w2_hc = jnp.transpose(w2)                      # (H, C)
    if (Cp, Hp) != (C, H):
        w1_ch = jnp.pad(w1_ch, ((0, Cp - C), (0, Hp - H)))
        w2_hc = jnp.pad(w2_hc, ((0, Hp - H), (0, Cp - C)))

    # ---- row tile: sublane-aligned, multi-step grid, VMEM-safe on v7x (64 MiB) ----
    row_align = 16 if x.dtype == jnp.bfloat16 else 8
    if tile_m is None:
        tile_m = 512                               # good default for C ~ 512..1024
    tile_m = max(row_align,
                 _round_up(min(tile_m, _round_up(N, row_align)), row_align))

    grid_m = pl.cdiv(N, tile_m)
    Np = grid_m * tile_m
    if (Np, Cp) != (N, C):
        x_p = jnp.pad(x, ((0, Np - N), (0, Cp - C)))
    else:
        x_p = x

    # ---- explicit VMEM budget: double-buffered x/out tiles + weights + f32 hidden ----
    act_bytes = jnp.dtype(x.dtype).itemsize
    w_bytes = jnp.dtype(w1.dtype).itemsize
    est_vmem = (2 * 2 * tile_m * Cp * act_bytes      # x + out tiles, double-buffered
                + 2 * 2 * Cp * Hp * w_bytes          # both weights (conservatively x2)
                + tile_m * Hp * 4)                   # f32 hidden intermediate
    compiler_kwargs = dict(dimension_semantics=("parallel",))
    if est_vmem > (24 << 20):
        # Raise above the 32 MiB scoped default but stay under v7x's 64 MiB physical VMEM.
        compiler_kwargs["vmem_limit_bytes"] = int(min(2 * est_vmem, 60 << 20))

    out_p = pl.pallas_call(
        adapter_kernel,
        out_shape=jax.ShapeDtypeStruct((Np, Cp), x.dtype),
        grid_spec=pltpu.PrefetchScalarGridSpec(
            num_scalar_prefetch=0,
            grid=(grid_m,),
            in_specs=[
                pl.BlockSpec((tile_m, Cp), lambda i: (i, 0)),   # x: batch-tiled
                pl.BlockSpec((Cp, Hp), lambda i: (0, 0)),       # W1^T: VMEM-resident
                pl.BlockSpec((Hp, Cp), lambda i: (0, 0)),       # W2^T: VMEM-resident
            ],
            out_specs=pl.BlockSpec((tile_m, Cp), lambda i: (i, 0)),
        ),
        compiler_params=pltpu.CompilerParams(**compiler_kwargs),
    )(x_p, w1_ch, w2_hc)

    if (Np, Cp) != (N, C):
        out_p = out_p[:N, :C]
    return out_p


def adapter_ref(x, w1, w2):
    h = jnp.maximum(x @ w1.T, 0.0)
    return jnp.maximum(h @ w2.T, 0.0)


if __name__ == "__main__":
    # TODO(synk): only the Adapter MLP of kgcoop_vl is kernelized; the CLIP image/text
    # encoders, prompt assembly, cosine score and dataset-specific logit slicing stay in JAX/XLA.
    key = jax.random.PRNGKey(0)

    # Shapes consistent with the module: kgcoop_vl uses Adapter(512, 4) -> C=512, H=128.
    # The second (C=32, H=8) case exercises the lane-padding path for C/H < 128 and
    # the ragged-batch (N not multiple of tile) path is exercised by N=6.
    for (N, C, RED) in [(6, 512, 4), (8, 32, 4)]:
        H = C // RED
        kx, k1, k2, key = jax.random.split(key, 4)
        x = jax.random.normal(kx, (N, C), dtype=jnp.float32)
        w1 = jax.random.normal(k1, (H, C), dtype=jnp.float32) * (1.0 / (C ** 0.5))
        w2 = jax.random.normal(k2, (C, H), dtype=jnp.float32) * (1.0 / (H ** 0.5))

        out = jax.block_until_ready(adapter_forward(x, w1, w2))
        ref = adapter_ref(x, w1, w2)
        assert out.shape == (N, C)
        assert jnp.allclose(out, ref, atol=2e-5, rtol=2e-5), f"mismatch for N={N}, C={C}"

    print("KERNEL_OK")
</pallas_src>

<mosaic_0001>
module attributes {stable_mosaic.version = 11 : i64} {
  func.func @adapter_kernel(%arg0: i32, %arg1: memref<8x512xf32, #tpu.memory_space<vmem>>, %arg2: memref<512x128xf32, #tpu.memory_space<vmem>>, %arg3: memref<128x512xf32, #tpu.memory_space<vmem>>, %arg4: memref<8x512xf32, #tpu.memory_space<vmem>>) attributes {dimension_semantics = [#tpu.dimension_semantics<parallel>], iteration_bounds = array<i64: 1>, scalar_prefetch = 0 : i64, scratch_operands = 0 : i64, tpu.core_type = #tpu.core_type<tc>, window_params = [{transform_indices = @transform_0, window_bounds = array<i64: 8, 512>}, {pipeline_mode = #tpu.pipeline_mode<synchronous>, transform_indices = @transform_1, window_bounds = array<i64: 512, 128>}, {pipeline_mode = #tpu.pipeline_mode<synchronous>, transform_indices = @transform_2, window_bounds = array<i64: 128, 512>}, {transform_indices = @transform_3, window_bounds = array<i64: 8, 512>}]} {
    %c0 = arith.constant 0 : index
    %c0_0 = arith.constant 0 : index
    %0 = vector.load %arg1[%c0, %c0_0] : memref<8x512xf32, #tpu.memory_space<vmem>>, vector<8x512xf32>
    %c0_1 = arith.constant 0 : index
    %c0_2 = arith.constant 0 : index
    %1 = vector.load %arg2[%c0_1, %c0_2] : memref<512x128xf32, #tpu.memory_space<vmem>>, vector<512x128xf32>
    %cst = arith.constant dense<0.000000e+00> : vector<8x128xf32>
    %2 = tpu.matmul %0, %1, %cst {dimension_numbers = #tpu.dot_dimension_numbers<[1], [0], [0], [1], [0, 0, 1, 1], [], []>} : vector<8x512xf32>, vector<512x128xf32>, vector<8x128xf32> -> vector<8x128xf32>
    %cst_3 = arith.constant 0.000000e+00 : f32
    %3 = vector.broadcast %cst_3 : f32 to vector<8x128xf32>
    %4 = arith.maximumf %2, %3 : vector<8x128xf32>
    %c0_4 = arith.constant 0 : index
    %c0_5 = arith.constant 0 : index
    %5 = vector.load %arg3[%c0_4, %c0_5] : memref<128x512xf32, #tpu.memory_space<vmem>>, vector<128x512xf32>
    %cst_6 = arith.constant dense<0.000000e+00> : vector<8x512xf32>
    %6 = tpu.matmul %4, %5, %cst_6 {dimension_numbers = #tpu.dot_dimension_numbers<[1], [0], [0], [1], [0, 0, 1, 1], [], []>} : vector<8x128xf32>, vector<128x512xf32>, vector<8x512xf32> -> vector<8x512xf32>
    %cst_7 = arith.constant 0.000000e+00 : f32
    %7 = vector.broadcast %cst_7 : f32 to vector<8x512xf32>
    %8 = arith.maximumf %6, %7 : vector<8x512xf32>
    %c0_8 = arith.constant 0 : index
    %c0_9 = arith.constant 0 : index
    %9 = vector.load %arg4[%c0_8, %c0_9] : memref<8x512xf32, #tpu.memory_space<vmem>>, vector<8x512xf32>
    tpu.vector_store %arg4[%c0_8, %c0_9], %8 {strides = array<i32>} : memref<8x512xf32, #tpu.memory_space<vmem>>, vector<8x512xf32>,
    return
  }
  func.func @transform_0(%arg0: i32) -> (i32, i32) {
    %c0_i32 = arith.constant 0 : i32
    %c0_i32_0 = arith.constant 0 : i32
    return %arg0, %c0_i32 : i32, i32
  }
  func.func @transform_1(%arg0: i32) -> (i32, i32) {
    %c0_i32 = arith.constant 0 : i32
    %c0_i32_0 = arith.constant 0 : i32
    %c0_i32_1 = arith.constant 0 : i32
    return %c0_i32, %c0_i32_0 : i32, i32
  }
  func.func @transform_2(%arg0: i32) -> (i32, i32) {
    %c0_i32 = arith.constant 0 : i32
    %c0_i32_0 = arith.constant 0 : i32
    %c0_i32_1 = arith.constant 0 : i32
    return %c0_i32, %c0_i32_0 : i32, i32
  }
  func.func @transform_3(%arg0: i32) -> (i32, i32) {
    %c0_i32 = arith.constant 0 : i32
    %c0_i32_0 = arith.constant 0 : i32
    return %arg0, %c0_i32 : i32, i32
  }
}

</mosaic_0001>

<bundles_post_ra>
// kernel: tpu_custom_call.1
= control target key start
LH: loop header
LB: loop body
LE: loop exit
PB: predicated region body
PF: predicated region fallthrough
CT: control target
= control target key end

     0   :  { %8 = vsyncpa [#allocation3], 0  ;;  %s871_s0 = inlined_call_operand.hbm [shape: f32[8,512], index: 0, kind: input, shape index: {}]   ;;  %s872_s1 = inlined_call_operand.hbm [shape: f32[512,128], index: 1, kind: input, shape index: {}]   ;;  %s873_s2 = inlined_call_operand.hbm [shape: f32[128,512], index: 2, kind: input, shape index: {}]   ;;  %s874_s3 = inlined_call_operand.hbm [shape: f32[8,512], index: 3, kind: output, shape index: {}]  }
   0x1   :  { %9 = vsyncpa [#allocation6], 0 }
   0x2   :  { %10 = vsyncpa [#allocation4], 0  ;;  %s794_s12 = smov [#allocation5]   ;;  %s700_s16 = scalar_lea.hbm %s872_s1, 8192 }
   0x3   :  { %s26_s13 = sshll.u32 %s794_s12, 4  ;;  %p701_p0 = scmp.ne.s32.totalorder %s872_s1, %s700_s16  ;;  %s27_s13 = int_to_ptr.vmem [resolvable:$true] %s26_s13 }
   0x4   :  { %p704_p1 = scmp.lt.u32.totalorder %s700_s16, %s872_s1 }
   0x6   :  { %p706_p2 = pnand %p704_p1, %p701_p0 }
   0x8   :  { %709 = shalt.err (!%p706_p2)
}
   0x9   :  { %s710_s21 = scalar_lea.vmem %s27_s13, 8192  ;;  %p715_p4 = scmp.lt.s32.totalorder %s27_s13, %s27_s13 }
   0xa   :  { %p711_p3 = scmp.ne.s32.totalorder %s27_s13, %s710_s21  ;;  %p716_p5 = scmp.lt.s32.totalorder %s710_s21, %s710_s21 }
   0xc   :  { %p717_p6 = por %p716_p5, %p715_p4 }
   0xe   :  { %p718_p7 = pnand %p717_p6, %p711_p3 }
  0x10   :  { %721 = shalt.err (!%p718_p7)
}
  0x11   :  { %s795_s22 = smov 128   ;;  %s796_s23 = smov 8  }
  0x12   :  { %32 = dma.hbm_to_vmem [thread:$0]  %s872_s1, 8192, %s27_s13, [#allocation6], %s795_s22, %s795_s22, %s796_s23  }
  0x13   :  { %s797_s26 = smov [#allocation2]   ;;  %s798_s28 = smov [#allocation7]  }
  0x14   :  { %s17_s27 = sshll.u32 %s797_s26, 4  ;;  %s38_s29 = sshll.u32 %s798_s28, 4  ;;  %s18_s27 = int_to_ptr.vmem [resolvable:$true] %s17_s27  ;;  %s39_s29 = int_to_ptr.vmem [resolvable:$true] %s38_s29 }
  0x15   :  { %s722_s5 = scalar_lea.hbm %s871_s0, 512 }
  0x16   :  { %p723_p8 = scmp.ne.s32.totalorder %s871_s0, %s722_s5  ;;  %p726_p9 = scmp.lt.u32.totalorder %s722_s5, %s871_s0 }
  0x18   :  { %p728_p10 = pnand %p726_p9, %p723_p8 }
  0x1a   :  { %731 = shalt.err (!%p728_p10)
}
  0x1b   :  { %s732_s1 = scalar_lea.vmem %s18_s27, 512  ;;  %p737_p12 = scmp.lt.s32.totalorder %s18_s27, %s18_s27 }
  0x1c   :  { %p733_p11 = scmp.ne.s32.totalorder %s18_s27, %s732_s1  ;;  %p738_p13 = scmp.lt.s32.totalorder %s732_s1, %s732_s1 }
  0x1e   :  { %p739_p0 = por %p738_p13, %p737_p12 }
  0x20   :  { %p740_p1 = pnand %p739_p0, %p733_p11 }
  0x22   :  { %743 = shalt.err (!%p740_p1)
}
  0x23   :  { %20 = dma.hbm_to_vmem [thread:$0]  %s871_s0, 512, %s18_s27, [#allocation3]  }
  0x24   :  { %s744_s14 = scalar_lea.hbm %s873_s2, 8192 }
  0x25   :  { %p745_p2 = scmp.ne.s32.totalorder %s873_s2, %s744_s14  ;;  %p748_p3 = scmp.lt.u32.totalorder %s744_s14, %s873_s2 }
  0x27   :  { %p750_p4 = pnand %p748_p3, %p745_p2 }
  0x29   :  { %753 = shalt.err (!%p750_p4)
}
  0x2a   :  { %s754_s19 = scalar_lea.vmem %s39_s29, 8192  ;;  %p759_p6 = scmp.lt.s32.totalorder %s39_s29, %s39_s29 }
  0x2b   :  { %p755_p5 = scmp.ne.s32.totalorder %s39_s29, %s754_s19  ;;  %p760_p7 = scmp.lt.s32.totalorder %s754_s19, %s754_s19 }
  0x2d   :  { %p761_p8 = por %p760_p7, %p759_p6 }
  0x2f   :  { %p762_p9 = pnand %p761_p8, %p755_p5 }
  0x31   :  { %765 = shalt.err (!%p762_p9)
}
  0x32   :  { %s799_s0 = smov 512   ;;  %s800_s20 = smov 32  }
  0x33   :  { %44 = dma.hbm_to_vmem [thread:$0]  %s873_s2, 8192, %s39_s29, [#allocation6], %s799_s0, %s799_s0, %s800_s20  }
  0x34   :  { %788 = dma.done.wait [#allocation3], 512  }
  0x35   :  { %789 = vsyncadd [#allocation3], 4294966784 }
  0x36   :  { %790 = dma.done.wait [#allocation6], 16384  }
  0x37   :  { %791 = vsyncadd [#allocation6], 4294950912  ;;  %v74_v0 = vld [vmem:[#allocation5 + $0x80] sm:$0xff]  ;;  %v75_v1 = vld [vmem:[#allocation5 + $0x88] sm:$0xff]  ;;  %s802_s2 = smov [#allocation8]  }
  0x38   :  { %v106_v2 = vld [vmem:[#allocation5 + $0x180] sm:$0xff]  ;;  %v563_v3 = vpack.c.bf16 %v75_v1, %v74_v0  ;;  %v107_v4 = vld [vmem:[#allocation5 + $0x188] sm:$0xff]  ;;  %v76_v11 = vld [vmem:[#allocation5 + $0x90] sm:$0xff]  ;;  %s483_s23 = sshll.u32 %s802_s2, 4  ;;  %s484_s23 = int_to_ptr.vmem [resolvable:$true] %s483_s23 }
  0x39   :  { %v58_v5 = vld [vmem:[#allocation5] sm:$0xff]  ;;  %v59_v6 = vld [vmem:[#allocation5 + $0x8] sm:$0xff]  ;;  %v595_v7 = vpack.c.bf16 %v107_v4, %v106_v2  ;;  %v77_v13 = vld [vmem:[#allocation5 + $0x98] sm:$0xff]  ;;  %s766_s24 = scalar_lea.vmem %s484_s23, 512  ;;  %p771_p11 = scmp.lt.s32.totalorder %s484_s23, %s484_s23 }
  0x3a   :  { %v565_v8 = vpack.c.bf16 %v59_v6, %v58_v5  ;;  %v90_v9 = vld [vmem:[#allocation5 + $0x100] sm:$0xff]  ;;  %v91_v10 = vld [vmem:[#allocation5 + $0x108] sm:$0xff]  ;;  %564 = vmatprep.subr.bf16.mxu0 %v563_v3  ;;  %v108_v14 = vld [vmem:[#allocation5 + $0x190] sm:$0xff]  ;;  %v567_v16 = vpack.c.bf16 %v77_v13, %v76_v11  ;;  %p767_p10 = scmp.ne.s32.totalorder %s484_s23, %s766_s24  ;;  %p772_p12 = scmp.lt.s32.totalorder %s766_s24, %s766_s24 }
  0x3b   :  { %v597_v12 = vpack.c.bf16 %v91_v10, %v90_v9  ;;  %v109_v15 = vld [vmem:[#allocation5 + $0x198] sm:$0xff]  ;;  %596 = vmatprep.subr.bf16.mxu1 %v595_v7  ;;  %v60_v18 = vld [vmem:[#allocation5 + $0x10] sm:$0xff]  ;;  %v78_v23 = vld [vmem:[#allocation5 + $0xa0] sm:$0xff] }
  0x3c   :  { %566 = vmatpush3.bf16.msra.mxu0 %v565_v8  ;;  %v599_v17 = vpack.c.bf16 %v109_v15, %v108_v14  ;;  %v61_v19 = vld [vmem:[#allocation5 + $0x18] sm:$0xff]  ;;  %v92_v20 = vld [vmem:[#allocation5 + $0x110] sm:$0xff]  ;;  %v79_v24 = vld [vmem:[#allocation5 + $0xa8] sm:$0xff]  ;;  %p773_p13 = por %p772_p12, %p771_p11 }
  0x3d   :  { %598 = vmatpush3.bf16.msra.mxu1 %v597_v12  ;;  %v569_v21 = vpack.c.bf16 %v61_v19, %v60_v18  ;;  %v93_v22 = vld [vmem:[#allocation5 + $0x118] sm:$0xff]  ;;  %568 = vmatprep.subr.bf16.mxu0 %v567_v16  ;;  %v571_v26 = vpack.c.bf16 %v79_v24, %v78_v23  ;;  %v110_v27 = vld [vmem:[#allocation5 + $0x1a0] sm:$0xff]  ;;  %v111_v28 = vld [vmem:[#allocation5 + $0x1a8] sm:$0xff] }
  0x3e   :  { %600 = vmatprep.subr.bf16.mxu1 %v599_v17  ;;  %v601_v25 = vpack.c.bf16 %v93_v22, %v92_v20  ;;  %v62_v29 = vld [vmem:[#allocation5 + $0x20] sm:$0xff]  ;;  %v603_v30 = vpack.c.bf16 %v111_v28, %v110_v27  ;;  %v63_v31 = vld [vmem:[#allocation5 + $0x28] sm:$0xff]  ;;  %v80_v35 = vld [vmem:[#allocation5 + $0xb0] sm:$0xff]  ;;  %p774_p0 = pnand %p773_p13, %p767_p10 }
  0x3f   :  { %v94_v32 = vld [vmem:[#allocation5 + $0x120] sm:$0xff]  ;;  %v95_v33 = vld [vmem:[#allocation5 + $0x128] sm:$0xff]  ;;  %v573_v34 = vpack.c.bf16 %v63_v31, %v62_v29  ;;  %v81_v36 = vld [vmem:[#allocation5 + $0xb8] sm:$0xff] }
  0x40   :  { %570 = vmatpush3.bf16.msra.mxu0 %v569_v21  ;;  %v112_v37 = vld [vmem:[#allocation5 + $0x1b0] sm:$0xff]  ;;  %v605_v38 = vpack.c.bf16 %v95_v33, %v94_v32  ;;  %v575_v39 = vpack.c.bf16 %v81_v36, %v80_v35  ;;  %v113_v40 = vld [vmem:[#allocation5 + $0x1b8] sm:$0xff]  ;;  %v82_v46 = vld [vmem:[#allocation5 + $0xc0] sm:$0xff] }
  0x41   :  { %602 = vmatpush3.bf16.msra.mxu1 %v601_v25  ;;  %572 = vmatprep.subr.bf16.mxu0 %v571_v26  ;;  %v64_v41 = vld [vmem:[#allocation5 + $0x30] sm:$0xff]  ;;  %v65_v42 = vld [vmem:[#allocation5 + $0x38] sm:$0xff]  ;;  %v607_v43 = vpack.c.bf16 %v113_v40, %v112_v37  ;;  %v83_v47 = vld [vmem:[#allocation5 + $0xc8] sm:$0xff] }
  0x42   :  { %604 = vmatprep.subr.bf16.mxu1 %v603_v30  ;;  %v96_v44 = vld [vmem:[#allocation5 + $0x130] sm:$0xff]  ;;  %v97_v45 = vld [vmem:[#allocation5 + $0x138] sm:$0xff]  ;;  %v114_v48 = vld [vmem:[#allocation5 + $0x1c0] sm:$0xff]  ;;  %v577_v50 = vpack.c.bf16 %v65_v42, %v64_v41  ;;  %v579_v52 = vpack.c.bf16 %v83_v47, %v82_v46 }
  0x43   :  { %v115_v49 = vld [vmem:[#allocation5 + $0x1c8] sm:$0xff]  ;;  %v609_v51 = vpack.c.bf16 %v97_v45, %v96_v44  ;;  %v66_v53 = vld [vmem:[#allocation5 + $0x40] sm:$0xff]  ;;  %v84_v58 = vld [vmem:[#allocation5 + $0xd0] sm:$0xff] }
  0x44   :  { %574 = vmatpush3.bf16.msra.mxu0 %v573_v34  ;;  %v67_v54 = vld [vmem:[#allocation5 + $0x48] sm:$0xff]  ;;  %v98_v55 = vld [vmem:[#allocation5 + $0x140] sm:$0xff]  ;;  %v611_v56 = vpack.c.bf16 %v115_v49, %v114_v48  ;;  %v85_v59 = vld [vmem:[#allocation5 + $0xd8] sm:$0xff] }
  0x45   :  { %606 = vmatpush3.bf16.msra.mxu1 %v605_v38  ;;  %576 = vmatprep.subr.bf16.mxu0 %v575_v39  ;;  %v99_v57 = vld [vmem:[#allocation5 + $0x148] sm:$0xff]  ;;  %v116_v60 = vld [vmem:[#allocation5 + $0x1d0] sm:$0xff]  ;;  %v117_v61 = vld [vmem:[#allocation5 + $0x1d8] sm:$0xff]  ;;  %v581_v62 = vpack.c.bf16 %v67_v54, %v66_v53  ;;  %v583_v0 = vpack.c.bf16 %v85_v59, %v84_v58 }
  0x46   :  { %608 = vmatprep.subr.bf16.mxu1 %v607_v43  ;;  %v613_v63 = vpack.c.bf16 %v99_v57, %v98_v55  ;;  %v68_v1 = vld [vmem:[#allocation5 + $0x50] sm:$0xff]  ;;  %v69_v2 = vld [vmem:[#allocation5 + $0x58] sm:$0xff]  ;;  %v615_v4 = vpack.c.bf16 %v117_v61, %v116_v60  ;;  %v86_v6 = vld [vmem:[#allocation5 + $0xe0] sm:$0xff] }
  0x47   :  { %v100_v3 = vld [vmem:[#allocation5 + $0x150] sm:$0xff]  ;;  %v101_v5 = vld [vmem:[#allocation5 + $0x158] sm:$0xff]  ;;  %v87_v7 = vld [vmem:[#allocation5 + $0xe8] sm:$0xff]  ;;  %v585_v10 = vpack.c.bf16 %v69_v2, %v68_v1 }
  0x48   :  { %578 = vmatpush3.bf16.msra.mxu0 %v577_v50  ;;  %v118_v8 = vld [vmem:[#allocation5 + $0x1e0] sm:$0xff]  ;;  %v119_v9 = vld [vmem:[#allocation5 + $0x1e8] sm:$0xff]  ;;  %v617_v13 = vpack.c.bf16 %v101_v5, %v100_v3  ;;  %v587_v14 = vpack.c.bf16 %v87_v7, %v86_v6  ;;  %v57_v17 = vld [vmem:[#allocation2 + $0x18] sm:$0xff] }
  0x49   :  { %610 = vmatpush3.bf16.msra.mxu1 %v609_v51  ;;  %580 = vmatprep.subr.bf16.mxu0 %v579_v52  ;;  %v70_v11 = vld [vmem:[#allocation5 + $0x60] sm:$0xff]  ;;  %v71_v12 = vld [vmem:[#allocation5 + $0x68] sm:$0xff]  ;;  %v619_v18 = vpack.c.bf16 %v119_v9, %v118_v8  ;;  %v88_v20 = vld [vmem:[#allocation5 + $0xf0] sm:$0xff] }
  0x4a   :  { %612 = vmatprep.subr.bf16.mxu1 %v611_v56  ;;  %v102_v15 = vld [vmem:[#allocation5 + $0x160] sm:$0xff]  ;;  %v55_v16 = vld [vmem:[#allocation2 + $0x8] sm:$0xff]  ;;  %v89_v21 = vld [vmem:[#allocation5 + $0xf8] sm:$0xff]  ;;  %256 = vmatprep.mubr.f32.mxu1 %v57_v17  ;;  %v589_v24 = vpack.c.bf16 %v71_v12, %v70_v11 }
  0x4b   :  { %v103_v19 = vld [vmem:[#allocation5 + $0x168] sm:$0xff]  ;;  %186 = vmatprep.mubr.f32.mxu0 %v55_v16  ;;  %v120_v22 = vld [vmem:[#allocation5 + $0x1f0] sm:$0xff]  ;;  %v121_v23 = vld [vmem:[#allocation5 + $0x1f8] sm:$0xff]  ;;  %v591_v26 = vpack.c.bf16 %v89_v21, %v88_v20 }
  0x4c   :  { %582 = vmatpush3.bf16.msra.mxu0 %v581_v62  ;;  %v621_v25 = vpack.c.bf16 %v103_v19, %v102_v15  ;;  %v72_v27 = vld [vmem:[#allocation5 + $0x70] sm:$0xff]  ;;  %v73_v28 = vld [vmem:[#allocation5 + $0x78] sm:$0xff]  ;;  %v623_v30 = vpack.c.bf16 %v121_v23, %v120_v22  ;;  %v264_v32 = vld [vmem:[#allocation7 + $0x8] sm:$0xff] }
  0x4d   :  { %614 = vmatpush3.bf16.msra.mxu1 %v613_v63  ;;  %584 = vmatprep.subr.bf16.mxu0 %v583_v0  ;;  %v104_v29 = vld [vmem:[#allocation5 + $0x170] sm:$0xff]  ;;  %v105_v31 = vld [vmem:[#allocation5 + $0x178] sm:$0xff]  ;;  %v268_v33 = vld [vmem:[#allocation7 + $0x28] sm:$0xff]  ;;  %v593_v36 = vpack.c.bf16 %v73_v28, %v72_v27 }
  0x4e   :  { %616 = vmatprep.subr.bf16.mxu1 %v615_v4  ;;  %v266_v34 = vld [vmem:[#allocation7 + $0x18] sm:$0xff]  ;;  %v625_v37 = vpack.c.bf16 %v105_v31, %v104_v29  ;;  %v627_v38 = vpack.c.bf16 %v268_v33, %v264_v32  ;;  %v263_v39 = vld [vmem:[#allocation7] sm:$0xff]  ;;  %v265_v41 = vld [vmem:[#allocation7 + $0x10] sm:$0xff] }
  0x4f   :  { %v270_v35 = vld [vmem:[#allocation7 + $0x38] sm:$0xff]  ;;  %v267_v40 = vld [vmem:[#allocation7 + $0x20] sm:$0xff]  ;;  %v269_v43 = vld [vmem:[#allocation7 + $0x30] sm:$0xff] }
  0x50   :  { %586 = vmatpush3.bf16.msra.mxu0 %v585_v10  ;;  %v659_v42 = vpack.c.bf16 %v270_v35, %v266_v34  ;;  %v272_v44 = vld [vmem:[#allocation7 + $0x48] sm:$0xff]  ;;  %v274_v46 = vld [vmem:[#allocation7 + $0x58] sm:$0xff]  ;;  %v54_v48 = vld [vmem:[#allocation2] sm:$0xff]  ;;  %v629_v50 = vpack.c.bf16 %v267_v40, %v263_v39  ;;  %v661_v51 = vpack.c.bf16 %v269_v43, %v265_v41 }
  0x51   :  { %618 = vmatpush3.bf16.msra.mxu1 %v617_v13  ;;  %588 = vmatprep.subr.bf16.mxu0 %v587_v14  ;;  %v276_v45 = vld [vmem:[#allocation7 + $0x68] sm:$0xff]  ;;  %v278_v47 = vld [vmem:[#allocation7 + $0x78] sm:$0xff]  ;;  %v56_v49 = vld [vmem:[#allocation2 + $0x10] sm:$0xff] }
  0x52   :  { %620 = vmatprep.subr.bf16.mxu1 %v619_v18  ;;  %v631_v52 = vpack.c.bf16 %v276_v45, %v272_v44  ;;  %v271_v53 = vld [vmem:[#allocation7 + $0x40] sm:$0xff]  ;;  %v273_v55 = vld [vmem:[#allocation7 + $0x50] sm:$0xff]  ;;  %v663_v56 = vpack.c.bf16 %v278_v47, %v274_v46  ;;  %v280_v58 = vld [vmem:[#allocation7 + $0x88] sm:$0xff] }
  0x53   :  { %v275_v54 = vld [vmem:[#allocation7 + $0x60] sm:$0xff]  ;;  %v277_v57 = vld [vmem:[#allocation7 + $0x70] sm:$0xff]  ;;  %v284_v59 = vld [vmem:[#allocation7 + $0xa8] sm:$0xff] }
  0x54   :  { %590 = vmatpush3.bf16.msra.mxu0 %v589_v24  ;;  %v282_v60 = vld [vmem:[#allocation7 + $0x98] sm:$0xff]  ;;  %v633_v62 = vpack.c.bf16 %v275_v54, %v271_v53  ;;  %v665_v63 = vpack.c.bf16 %v277_v57, %v273_v55  ;;  %v635_v0 = vpack.c.bf16 %v284_v59, %v280_v58  ;;  %v279_v1 = vld [vmem:[#allocation7 + $0x80] sm:$0xff]  ;;  %v281_v3 = vld [vmem:[#allocation7 + $0x90] sm:$0xff] }
  0x55   :  { %622 = vmatpush3.bf16.msra.mxu1 %v621_v25  ;;  %592 = vmatprep.subr.bf16.mxu0 %v591_v26  ;;  %v286_v61 = vld [vmem:[#allocation7 + $0xb8] sm:$0xff]  ;;  %v283_v2 = vld [vmem:[#allocation7 + $0xa0] sm:$0xff]  ;;  %v285_v5 = vld [vmem:[#allocation7 + $0xb0] sm:$0xff] }
  0x56   :  { %624 = vmatprep.subr.bf16.mxu1 %v623_v30  ;;  %v667_v4 = vpack.c.bf16 %v286_v61, %v282_v60  ;;  %v288_v6 = vld [vmem:[#allocation7 + $0xc8] sm:$0xff]  ;;  %v290_v8 = vld [vmem:[#allocation7 + $0xd8] sm:$0xff]  ;;  %v637_v10 = vpack.c.bf16 %v283_v2, %v279_v1  ;;  %v669_v11 = vpack.c.bf16 %v285_v5, %v281_v3  ;;  %v287_v13 = vld [vmem:[#allocation7 + $0xc0] sm:$0xff] }
  0x57   :  { %v292_v7 = vld [vmem:[#allocation7 + $0xe8] sm:$0xff]  ;;  %v294_v9 = vld [vmem:[#allocation7 + $0xf8] sm:$0xff]  ;;  %v291_v14 = vld [vmem:[#allocation7 + $0xe0] sm:$0xff] }
  0x58   :  { %594 = vmatpush3.bf16.msra.mxu0 %v593_v36  ;;  %v639_v12 = vpack.c.bf16 %v292_v7, %v288_v6  ;;  %v289_v15 = vld [vmem:[#allocation7 + $0xd0] sm:$0xff]  ;;  %v671_v16 = vpack.c.bf16 %v294_v9, %v290_v8  ;;  %v296_v18 = vld [vmem:[#allocation7 + $0x108] sm:$0xff]  ;;  %v298_v20 = vld [vmem:[#allocation7 + $0x118] sm:$0xff]  ;;  %v641_v22 = vpack.c.bf16 %v291_v14, %v287_v13 }
  0x59   :  { %626 = vmatpush3.bf16.msra.mxu1 %v625_v37  ;;  %628 = vmatprep.subr.bf16.mxu0 %v627_v38  ;;  %v293_v17 = vld [vmem:[#allocation7 + $0xf0] sm:$0xff]  ;;  %v300_v19 = vld [vmem:[#allocation7 + $0x128] sm:$0xff]  ;;  %v302_v21 = vld [vmem:[#allocation7 + $0x138] sm:$0xff] }
  0x5a   :  { %660 = vmatprep.subr.bf16.mxu1 %v659_v42  ;;  %v673_v23 = vpack.c.bf16 %v293_v17, %v289_v15  ;;  %v643_v24 = vpack.c.bf16 %v300_v19, %v296_v18  ;;  %v295_v25 = vld [vmem:[#allocation7 + $0x100] sm:$0xff]  ;;  %v297_v27 = vld [vmem:[#allocation7 + $0x110] sm:$0xff]  ;;  %v675_v28 = vpack.c.bf16 %v302_v21, %v298_v20  ;;  %v304_v30 = vld [vmem:[#allocation7 + $0x148] sm:$0xff] }
  0x5b   :  { %187 = vmatmul.mubr.f32.vlgmr.msra.gmra.mrb[0].mxu0 %v54_v48  ;;  %v299_v26 = vld [vmem:[#allocation7 + $0x120] sm:$0xff]  ;;  %v301_v29 = vld [vmem:[#allocation7 + $0x130] sm:$0xff]  ;;  %v308_v31 = vld [vmem:[#allocation7 + $0x168] sm:$0xff] }
  0x5c   :  { %257 = vmatmul.mubr.f32.vlgmr.msra.gmra.mrb[0].mxu1 %v56_v49  ;;  %630 = vmatpush1.bf16.msra.mxu0 %v629_v50  ;;  %v306_v32 = vld [vmem:[#allocation7 + $0x158] sm:$0xff]  ;;  %v645_v34 = vpack.c.bf16 %v299_v26, %v295_v25  ;;  %v677_v35 = vpack.c.bf16 %v301_v29, %v297_v27  ;;  %v647_v36 = vpack.c.bf16 %v308_v31, %v304_v30  ;;  %v303_v37 = vld [vmem:[#allocation7 + $0x140] sm:$0xff]  ;;  %v305_v40 = vld [vmem:[#allocation7 + $0x150] sm:$0xff] }
  0x5d   :  { %662 = vmatpush1.bf16.msra.mxu1 %v661_v51  ;;  %632 = vmatprep.subr.bf16.mxu0 %v631_v52  ;;  %v310_v33 = vld [vmem:[#allocation7 + $0x178] sm:$0xff]  ;;  %v307_v38 = vld [vmem:[#allocation7 + $0x160] sm:$0xff]  ;;  %v309_v41 = vld [vmem:[#allocation7 + $0x170] sm:$0xff] }
  0x5e   :  { %664 = vmatprep.subr.bf16.mxu1 %v663_v56  ;;  %v679_v39 = vpack.c.bf16 %v310_v33, %v306_v32  ;;  %v649_v42 = vpack.c.bf16 %v307_v38, %v303_v37  ;;  %v681_v43 = vpack.c.bf16 %v309_v41, %v305_v40  ;;  %v312_v44 = vld [vmem:[#allocation7 + $0x188] sm:$0xff]  ;;  %v314_v46 = vld [vmem:[#allocation7 + $0x198] sm:$0xff]  ;;  %v311_v49 = vld [vmem:[#allocation7 + $0x180] sm:$0xff] }
  0x5f   :  { %v316_v45 = vld [vmem:[#allocation7 + $0x1a8] sm:$0xff]  ;;  %v318_v48 = vld [vmem:[#allocation7 + $0x1b8] sm:$0xff]  ;;  %v315_v50 = vld [vmem:[#allocation7 + $0x1a0] sm:$0xff] }
  0x60   :  { %634 = vmatpush1.bf16.msra.mxu0 %v633_v62  ;;  %v651_v47 = vpack.c.bf16 %v316_v45, %v312_v44  ;;  %v683_v51 = vpack.c.bf16 %v318_v48, %v314_v46  ;;  %v653_v52 = vpack.c.bf16 %v315_v50, %v311_v49  ;;  %v313_v53 = vld [vmem:[#allocation7 + $0x190] sm:$0xff]  ;;  %v320_v56 = vld [vmem:[#allocation7 + $0x1c8] sm:$0xff]  ;;  %v322_v58 = vld [vmem:[#allocation7 + $0x1d8] sm:$0xff] }
  0x61   :  { %666 = vmatpush1.bf16.msra.mxu1 %v665_v63  ;;  %636 = vmatprep.subr.bf16.mxu0 %v635_v0  ;;  %v317_v54 = vld [vmem:[#allocation7 + $0x1b0] sm:$0xff]  ;;  %v324_v57 = vld [vmem:[#allocation7 + $0x1e8] sm:$0xff]  ;;  %v326_v60 = vld [vmem:[#allocation7 + $0x1f8] sm:$0xff] }
  0x62   :  { %668 = vmatprep.subr.bf16.mxu1 %v667_v4  ;;  %v685_v55 = vpack.c.bf16 %v317_v54, %v313_v53  ;;  %v655_v59 = vpack.c.bf16 %v324_v57, %v320_v56  ;;  %v319_v61 = vld [vmem:[#allocation7 + $0x1c0] sm:$0xff]  ;;  %v687_v63 = vpack.c.bf16 %v326_v60, %v322_v58  ;;  %v321_v1 = vld [vmem:[#allocation7 + $0x1d0] sm:$0xff]  ;;  %v801_v4 = vmov 0.0  }
  0x63   :  { %v323_v62 = vld [vmem:[#allocation7 + $0x1e0] sm:$0xff]  ;;  %v325_v2 = vld [vmem:[#allocation7 + $0x1f0] sm:$0xff]  ;;  %391 = vmatprep.mubr.f32.mxu0 %v801_v4  ;;  %462 = vmatprep.mubr.f32.mxu1 %v801_v4 }
  0x64   :  { %638 = vmatpush1.bf16.msra.mxu0 %v637_v10  ;;  %v657_v0 = vpack.c.bf16 %v323_v62, %v319_v61  ;;  %v689_v3 = vpack.c.bf16 %v325_v2, %v321_v1 }
  0x65   :  { %670 = vmatpush1.bf16.msra.mxu1 %v669_v11  ;;  %640 = vmatprep.subr.bf16.mxu0 %v639_v12 }
  0x66   :  { %672 = vmatprep.subr.bf16.mxu1 %v671_v16 }
  0x68   :  { %642 = vmatpush1.bf16.msra.mxu0 %v641_v22 }
  0x69   :  { %674 = vmatpush1.bf16.msra.mxu1 %v673_v23  ;;  %644 = vmatprep.subr.bf16.mxu0 %v643_v24 }
  0x6a   :  { %676 = vmatprep.subr.bf16.mxu1 %v675_v28 }
  0x6c   :  { %646 = vmatpush1.bf16.msra.mxu0 %v645_v34 }
  0x6d   :  { %678 = vmatpush1.bf16.msra.mxu1 %v677_v35  ;;  %648 = vmatprep.subr.bf16.mxu0 %v647_v36 }
  0x6e   :  { %680 = vmatprep.subr.bf16.mxu1 %v679_v39 }
  0x70   :  { %650 = vmatpush1.bf16.msra.mxu0 %v649_v42 }
  0x71   :  { %682 = vmatpush1.bf16.msra.mxu1 %v681_v43  ;;  %652 = vmatprep.subr.bf16.mxu0 %v651_v47 }
  0x72   :  { %684 = vmatprep.subr.bf16.mxu1 %v683_v51 }
  0x74   :  { %654 = vmatpush1.bf16.msra.mxu0 %v653_v52 }
  0x75   :  { %686 = vmatpush1.bf16.msra.mxu1 %v685_v55  ;;  %656 = vmatprep.subr.bf16.mxu0 %v655_v59 }
  0x76   :  { %688 = vmatprep.subr.bf16.mxu1 %v687_v63 }
  0x78   :  { %658 = vmatpush1.bf16.msra.mxu0 %v657_v0 }
  0x79   :  { %690 = vmatpush1.bf16.msra.mxu1 %v689_v3 }
 0x12e   :  { %v525_v5 = vpop.f32.mrb[0].mxu0 }
 0x12f   :  { %v560_v6 = vpop.f32.mrb[0].mxu1  ;;  %v526_v7 = vpop.f32.mrb[1].mxu0 }
 0x130   :  { %v527_v8 = vadd.f32 %v526_v7, %v525_v5  ;;  %v561_v9 = vpop.f32.mrb[1].mxu1 }
 0x131   :  { %v562_v10 = vadd.f32 %v561_v9, %v560_v6 }
 0x133   :  { %v259_v11 = vadd.f32 %v562_v10, %v527_v8 }
 0x135   :  { %v262_v12 = vmax.f32 %v259_v11, 0.0 }
 0x137   :  { %392 = vmatmul.mubr.f32.vlgmr.msra.gmra.mrb[2].mxu0 %v262_v12  ;;  %463 = vmatmul.mubr.f32.vlgmr.msra.gmra.mrb[2].mxu1 %v262_v12 }
 0x20a   :  { %v393_v13 = vpop.f32.mrb[2].mxu0  ;;  %v464_v14 = vpop.f32.mrb[2].mxu1 }
 0x20b   :  { %v469_v15 = vmax.f32 %v393_v13, 0.0  ;;  %v471_v16 = vmax.f32 %v464_v14, 0.0  ;;  %v395_v17 = vpop.f32.mrb[3].mxu0  ;;  %v466_v18 = vpop.f32.mrb[3].mxu1 }
 0x20c   :  { %v470_v19 = vmax.f32 %v395_v17, 0.0  ;;  %v472_v20 = vmax.f32 %v466_v18, 0.0 }
 0x20d   :  { %473 = vst [vmem:[#allocation8] sm:$0xff] %v469_v15  ;;  %475 = vst [vmem:[#allocation8 + $0x10] sm:$0xff] %v471_v16 }
 0x20e   :  { %474 = vst [vmem:[#allocation8 + $0x8] sm:$0xff] %v470_v19  ;;  %476 = vst [vmem:[#allocation8 + $0x18] sm:$0xff] %v472_v20 }
 0x20f   :  { %777 = shalt.err (!%p774_p0)
}
 0x210   :  { %s778_s27 = scalar_lea.hbm %s874_s3, 512 }
 0x211   :  { %p779_p1 = scmp.ne.s32.totalorder %s874_s3, %s778_s27  ;;  %p782_p2 = scmp.lt.u32.totalorder %s778_s27, %s874_s3 }
 0x213   :  { %p784_p3 = pnand %p782_p2, %p779_p1 }
 0x215   :  { %787 = shalt.err (!%p784_p3)
}
 0x216   :  { %486 = dma.vmem_to_hbm [thread:$0]  %s484_s23, 512, %s874_s3, [#allocation4]  }
 0x217   :  { %792 = dma.done.wait [#allocation4], 512  }
 0x218   :  { %793 = vsyncadd [#allocation4], 4294966784 }
 0x219   :  { %490 = vsyncpa [#allocation3], 1 }
 0x21a   :  { %491 = vsyncpa [#allocation6], 1 }
 0x21b   :  { %492 = vsyncpa [#allocation4], 1 }

</bundles_post_ra>
